<compile_context>
chip_gen: v5e
topology: v5e:2x2
jax: 0.10.0
libtpu: 0.0.40
codegen_flags: <defaults>
</compile_context>

<pallas_src>
import functools

import jax
import jax.numpy as jnp
from jax import lax
from jax.experimental import pallas as pl
from jax.experimental.pallas import tpu as pltpu

EPS = 1e-5  # BatchNorm eps (PyTorch default)


def _round_up(x, m):
    return (x + m - 1) // m * m


# --------------------------------------------------------------------------- kernel
def _st_gcn_kernel(dh_ref, drc_ref, par_ref, o_ref, *,
                   N, T, V, K, C_in, C_out, kt):
    """Fused st_gcn forward on an N-folded, temporally padded, 128-padded lane layout.

    Lane layout (all big operands): column = n * L + (t + pad) * V + v, L = (T + 2*pad) * V,
    total N*L columns, zero-padded up to LP (multiple of 128).

    dh_ref : (K*C_in + K, LP)  A-contracted input rows + sum_v(A) rows (carry the gcn bias).
    drc_ref: (2*C_in + 1, LP)  raw-x rows | V-broadcast cond rows | valid-ones row.
    par_ref: (4*C_out, 128)    packed params:
                 rows [0,C)    cols [0, K*C_in+K)  : gcn pointwise mix | gcn bias (via sum_v A)
                 rows [C,2C)   cols [0, 2*C_in+1)  : residual 1x1 | cond 1x1 | (res_b+cond_b)
                 rows [2C,3C)  cols [0, kt*C_out)  : temporal taps, col = i*C_out + c
                 rows [3C,4C)  cols 0..4           : tcn_b, bn1_g, bn1_b, bn2_g, bn2_b
    o_ref  : (C_out, LP)       output slab (channel rows, lane-dense folded (n, t_pad, v)).
    """
    LP = dh_ref.shape[1]
    pad = (kt - 1) // 2
    L = (T + 2 * pad) * V
    TV = T * V
    inv_cnt = 1.0 / float(N * TV)

    # ---- unpack the packed parameter block (tile-aligned static slices) -------------
    par = par_ref[...]
    wh = par[0:C_out, 0:K * C_in + K]
    wrc = par[C_out:2 * C_out, 0:2 * C_in + 1]
    wtf = par[2 * C_out:3 * C_out, 0:kt * C_out]
    scal = par[3 * C_out:4 * C_out, :]
    bt = scal[:, 0:1]
    g1, b1 = scal[:, 1:2], scal[:, 2:3]
    g2, b2 = scal[:, 3:4], scal[:, 4:5]

    # ---- valid-column mask of the folded padded layout -------------------------------
    col = lax.broadcasted_iota(jnp.int32, (C_out, LP), 1)
    valid = None
    for n in range(N):                      # small static N -> trace-time unroll
        lo = n * L + pad * V
        m = (col >= lo) & (col < lo + TV)
        valid = m if valid is None else (valid | m)

    # ---- stacked pointwise stage: two wide MXU matmuls over the whole N-folded slab --
    h = jnp.dot(wh, dh_ref[...], preferred_element_type=jnp.float32)     # gcn pre-BN
    rc = jnp.dot(wrc, drc_ref[...], preferred_element_type=jnp.float32)  # residual + cond res

    # ---- BatchNorm1 (training stats over N*T*V; padding columns of h are exactly 0) --
    mu1 = jnp.sum(h, axis=1, keepdims=True) * inv_cnt
    var1 = jnp.sum(h * h, axis=1, keepdims=True) * inv_cnt - mu1 * mu1   # biased variance
    a1 = lax.rsqrt(var1 + EPS) * g1
    c1 = b1 - mu1 * a1
    # ReLU, then re-zero the temporal padding (the (kt,1) conv relies on zero pads).
    hr = jnp.where(valid, jnp.maximum(h * a1 + c1, 0.0), 0.0)

    # ---- (kt x 1) temporal conv: kt lane-shifted views stacked on sublanes, 1 matmul --
    taps = []
    for i in range(kt):
        d = (i - pad) * V                   # tap i reads hr[col + d]
        if d == 0:
            taps.append(hr)
        elif d > 0:
            taps.append(jnp.concatenate(
                [hr[:, d:], jnp.zeros((C_out, d), jnp.float32)], axis=1))
        else:
            taps.append(jnp.concatenate(
                [jnp.zeros((C_out, -d), jnp.float32), hr[:, :LP + d]], axis=1))
    stacked = jnp.concatenate(taps, axis=0)                               # (kt*C_out, LP)
    y = jnp.dot(wtf, stacked, preferred_element_type=jnp.float32) + bt

    # ---- BatchNorm2 (mask padding columns: they hold garbage after the shifts) -------
    ym = jnp.where(valid, y, 0.0)
    mu2 = jnp.sum(ym, axis=1, keepdims=True) * inv_cnt
    var2 = jnp.sum(ym * ym, axis=1, keepdims=True) * inv_cnt - mu2 * mu2
    a2 = lax.rsqrt(var2 + EPS) * g2
    c2 = b2 - mu2 * a2

    # ---- residual + conditional residual + final ReLU; lane-dense unmasked store -----
    o_ref[...] = jnp.where(valid, jnp.maximum(y * a2 + c2 + rc, 0.0), 0.0)


# --------------------------------------------------------------------------- forward
@jax.jit
def st_gcn_forward(x, cond, A, p):
    """x: (N, C_in, T, V)  cond: (N, C_in, T)  A: (K, V, V).  Returns (N, C_out, T, V)."""
    N, C_in, T, V = x.shape
    K = A.shape[0]
    C_out = p["tcn_b"].shape[0]
    kt = p["tcn_w"].shape[2]
    pad = (kt - 1) // 2
    L = (T + 2 * pad) * V
    LP = _round_up(N * L, 128)
    hprec = lax.Precision.HIGHEST

    # Re-associated graph conv: contract A with the raw C_in-channel input here (tiny XLA
    # fusion under jit); the K*C_in -> C_out mix + every bias happens on the MXU in-kernel.
    xa = jnp.einsum('nctv,kvw->nkctw', x, A, precision=hprec)        # (N, K, C_in, T, V)
    asum = jnp.sum(A, axis=1)                                        # (K, V): carries gcn bias

    def fold(z):
        # z: (R, N, T, V) -> (R, LP): zero-pad `pad` time steps per sample, flatten
        # (n, t_pad, v) onto the lane axis, pad lanes up to a multiple of 128.
        zp = jnp.pad(z, ((0, 0), (0, 0), (pad, pad), (0, 0))).reshape(z.shape[0], N * L)
        return jnp.pad(zp, ((0, 0), (0, LP - N * L)))

    dh = jnp.concatenate([
        fold(jnp.transpose(xa, (1, 2, 0, 3, 4)).reshape(K * C_in, N, T, V)),
        fold(jnp.broadcast_to(asum[:, None, None, :], (K, N, T, V))),
    ], axis=0)                                                       # (K*C_in + K, LP)

    drc = jnp.concatenate([
        fold(jnp.transpose(x, (1, 0, 2, 3))),
        fold(jnp.broadcast_to(jnp.transpose(cond, (1, 0, 2))[..., None], (C_in, N, T, V))),
        fold(jnp.ones((1, N, T, V), jnp.float32)),                   # bias/mask row
    ], axis=0)                                                       # (2*C_in + 1, LP)

    # -------- packed small-parameter block (one DMA instead of eight) ----------------
    Wg = p["gcn_w"][:, :, 0, 0]                                      # (K*C_out, C_in)
    wh = jnp.concatenate([
        Wg.reshape(K, C_out, C_in).transpose(1, 0, 2).reshape(C_out, K * C_in),
        p["gcn_b"].reshape(K, C_out).T,
    ], axis=1)                                                       # (C_out, K*C_in + K)
    wrc = jnp.concatenate([p["res_w"][:, :, 0, 0], p["cond_w"][:, :, 0],
                           (p["res_b"] + p["cond_b"])[:, None]], axis=1)   # (C_out, 2*C_in+1)
    wtf = jnp.transpose(p["tcn_w"][:, :, :, 0], (0, 2, 1)).reshape(C_out, kt * C_out)
    scal = jnp.stack([p["tcn_b"], p["bn1_g"], p["bn1_b"], p["bn2_g"], p["bn2_b"]], axis=1)

    PW = 128
    padw = lambda m: jnp.pad(m.astype(jnp.float32), ((0, 0), (0, PW - m.shape[1])))
    par = jnp.concatenate([padw(wh), padw(wrc), padw(wtf), padw(scal)], axis=0)  # (4*C_out, PW)

    out = pl.pallas_call(
        functools.partial(_st_gcn_kernel, N=N, T=T, V=V, K=K,
                          C_in=C_in, C_out=C_out, kt=kt),
        out_shape=jax.ShapeDtypeStruct((C_out, LP), jnp.float32),
        in_specs=[pl.BlockSpec(memory_space=pltpu.MemorySpace.VMEM)] * 3,
        out_specs=pl.BlockSpec(memory_space=pltpu.MemorySpace.VMEM),
    )(dh, drc, par)

    # Un-fold: drop lane padding, drop temporal padding, put batch dim back in front.
    out = out[:, :N * L].reshape(C_out, N, T + 2 * pad, V)[:, :, pad:pad + T, :]
    return jnp.transpose(out, (1, 0, 2, 3))


# -------------------------------------------------------------------- pure-JAX reference
def reference_forward(x, cond, A, p):
    N, C_in, T, V = x.shape
    K_sp = A.shape[0]
    C_out = p["tcn_b"].shape[0]
    kt = p["tcn_w"].shape[2]
    hp_prec = lax.Precision.HIGHEST

    xg = jnp.einsum('oc,nctv->notv', p["gcn_w"][:, :, 0, 0], x,
                    precision=hp_prec) + p["gcn_b"][None, :, None, None]
    xg = xg.reshape(N, K_sp, C_out, T, V)
    h = jnp.einsum('nkctv,kvw->nctw', xg, A, precision=hp_prec)

    mu = h.mean(axis=(0, 2, 3), keepdims=True)
    var = jnp.var(h, axis=(0, 2, 3), keepdims=True)
    hn = (h - mu) * lax.rsqrt(var + EPS) * p["bn1_g"][None, :, None, None] \
         + p["bn1_b"][None, :, None, None]
    hr = jnp.maximum(hn, 0.0)

    pad = (kt - 1) // 2
    hpd = jnp.pad(hr, ((0, 0), (0, 0), (pad, pad), (0, 0)))
    y = sum(jnp.einsum('oc,nctv->notv', p["tcn_w"][:, :, dt, 0],
                       hpd[:, :, dt:dt + T, :], precision=hp_prec)
            for dt in range(kt)) + p["tcn_b"][None, :, None, None]
    mu2 = y.mean(axis=(0, 2, 3), keepdims=True)
    var2 = jnp.var(y, axis=(0, 2, 3), keepdims=True)
    ybn = (y - mu2) * lax.rsqrt(var2 + EPS) * p["bn2_g"][None, :, None, None] \
          + p["bn2_b"][None, :, None, None]

    res = jnp.einsum('oc,nctv->notv', p["res_w"][:, :, 0, 0], x,
                     precision=hp_prec) + p["res_b"][None, :, None, None]
    c = jnp.einsum('oc,nct->not', p["cond_w"][:, :, 0], cond,
                   precision=hp_prec) + p["cond_b"][None, :, None]
    cres = jnp.repeat(c[..., None], V, axis=-1)
    return jnp.maximum(ybn + res + cres, 0.0)


# ------------------------------------------------------------------------------- main
if __name__ == "__main__":
    N, C_in, C_out, T, V = 2, 4, 8, 16, 21   # V must be 21 (hard-coded repeat in module)
    K_sp, kt = 2, 3                          # kernel_size = (3, 2)

    key = jax.random.PRNGKey(0)
    ks = jax.random.split(key, 16)

    params = {
        "gcn_w": 0.3 * jax.random.normal(ks[0], (K_sp * C_out, C_in, 1, 1), jnp.float32),
        "gcn_b": 0.1 * jax.random.normal(ks[1], (K_sp * C_out,), jnp.float32),
        "tcn_w": 0.3 * jax.random.normal(ks[2], (C_out, C_out, kt, 1), jnp.float32),
        "tcn_b": 0.1 * jax.random.normal(ks[3], (C_out,), jnp.float32),
        "res_w": 0.3 * jax.random.normal(ks[4], (C_out, C_in, 1, 1), jnp.float32),
        "res_b": 0.1 * jax.random.normal(ks[5], (C_out,), jnp.float32),
        "cond_w": 0.3 * jax.random.normal(ks[6], (C_out, C_in, 1), jnp.float32),
        "cond_b": 0.1 * jax.random.normal(ks[7], (C_out,), jnp.float32),
        "bn1_g": 1.0 + 0.1 * jax.random.normal(ks[8], (C_out,), jnp.float32),
        "bn1_b": 0.1 * jax.random.normal(ks[9], (C_out,), jnp.float32),
        "bn2_g": 1.0 + 0.1 * jax.random.normal(ks[10], (C_out,), jnp.float32),
        "bn2_b": 0.1 * jax.random.normal(ks[11], (C_out,), jnp.float32),
    }

    x = jax.random.normal(ks[12], (N, C_in, T, V), jnp.float32)
    cond = jax.random.normal(ks[13], (N, C_in, T), jnp.float32)
    A = 0.2 * jax.random.normal(ks[14], (K_sp, V, V), jnp.float32)

    out = jax.block_until_ready(st_gcn_forward(x, cond, A, params))
    ref = jax.block_until_ready(reference_forward(x, cond, A, params))

    assert out.shape == (N, C_out, T, V), out.shape
    assert jnp.allclose(out, ref, rtol=1e-2, atol=1e-2), \
        f"max abs err {float(jnp.max(jnp.abs(out - ref)))}"
    print("KERNEL_OK")
</pallas_src>

<mosaic_0001>
module attributes {stable_mosaic.version = 11 : i64} {
  func.func @_st_gcn_kernel(%arg0: memref<10x768xf32, #tpu.memory_space<vmem>>, %arg1: memref<9x768xf32, #tpu.memory_space<vmem>>, %arg2: memref<32x128xf32, #tpu.memory_space<vmem>>, %arg3: memref<8x768xf32, #tpu.memory_space<vmem>>) attributes {dimension_semantics = [], scalar_prefetch = 0 : i64, scratch_operands = 0 : i64, tpu.core_type = #tpu.core_type<tc>} {
    %c0 = arith.constant 0 : index
    %c0_0 = arith.constant 0 : index
    %0 = vector.load %arg2[%c0, %c0_0] : memref<32x128xf32, #tpu.memory_space<vmem>>, vector<32x128xf32>
    %1 = vector.extract_strided_slice %0 {offsets = [0, 0], sizes = [8, 10], strides = [1, 1]} : vector<32x128xf32> to vector<8x10xf32>
    %2 = vector.extract_strided_slice %0 {offsets = [8, 0], sizes = [8, 9], strides = [1, 1]} : vector<32x128xf32> to vector<8x9xf32>
    %3 = vector.extract_strided_slice %0 {offsets = [16, 0], sizes = [8, 24], strides = [1, 1]} : vector<32x128xf32> to vector<8x24xf32>
    %4 = vector.extract_strided_slice %0 {offsets = [24, 0], sizes = [8, 128], strides = [1, 1]} : vector<32x128xf32> to vector<8x128xf32>
    %5 = vector.extract_strided_slice %4 {offsets = [0, 0], sizes = [8, 1], strides = [1, 1]} : vector<8x128xf32> to vector<8x1xf32>
    %6 = vector.extract_strided_slice %4 {offsets = [0, 1], sizes = [8, 1], strides = [1, 1]} : vector<8x128xf32> to vector<8x1xf32>
    %7 = vector.extract_strided_slice %4 {offsets = [0, 2], sizes = [8, 1], strides = [1, 1]} : vector<8x128xf32> to vector<8x1xf32>
    %8 = vector.extract_strided_slice %4 {offsets = [0, 3], sizes = [8, 1], strides = [1, 1]} : vector<8x128xf32> to vector<8x1xf32>
    %9 = vector.extract_strided_slice %4 {offsets = [0, 4], sizes = [8, 1], strides = [1, 1]} : vector<8x128xf32> to vector<8x1xf32>
    %10 = tpu.iota {dimensions = array<i32: 1>} : vector<8x768xi32>
    %c21_i32 = arith.constant 21 : i32
    %11 = vector.broadcast %c21_i32 : i32 to vector<8x768xi32>
    %12 = arith.cmpi sge, %10, %11 : vector<8x768xi32>
    %c357_i32 = arith.constant 357 : i32
    %13 = vector.broadcast %c357_i32 : i32 to vector<8x768xi32>
    %14 = arith.cmpi slt, %10, %13 : vector<8x768xi32>
    %15 = arith.andi %12, %14 : vector<8x768xi1>
    %c399_i32 = arith.constant 399 : i32
    %16 = vector.broadcast %c399_i32 : i32 to vector<8x768xi32>
    %17 = arith.cmpi sge, %10, %16 : vector<8x768xi32>
    %c735_i32 = arith.constant 735 : i32
    %18 = vector.broadcast %c735_i32 : i32 to vector<8x768xi32>
    %19 = arith.cmpi slt, %10, %18 : vector<8x768xi32>
    %20 = arith.andi %17, %19 : vector<8x768xi1>
    %21 = arith.ori %15, %20 : vector<8x768xi1>
    %c0_1 = arith.constant 0 : index
    %c0_2 = arith.constant 0 : index
    %22 = vector.load %arg0[%c0_1, %c0_2] : memref<10x768xf32, #tpu.memory_space<vmem>>, vector<10x768xf32>
    %cst = arith.constant dense<0.000000e+00> : vector<8x768xf32>
    %23 = tpu.matmul %1, %22, %cst {dimension_numbers = #tpu.dot_dimension_numbers<[1], [0], [0], [1], [0, 0, 1, 1], [], []>} : vector<8x10xf32>, vector<10x768xf32>, vector<8x768xf32> -> vector<8x768xf32>
    %c0_3 = arith.constant 0 : index
    %c0_4 = arith.constant 0 : index
    %24 = vector.load %arg1[%c0_3, %c0_4] : memref<9x768xf32, #tpu.memory_space<vmem>>, vector<9x768xf32>
    %cst_5 = arith.constant dense<0.000000e+00> : vector<8x768xf32>
    %25 = tpu.matmul %2, %24, %cst_5 {dimension_numbers = #tpu.dot_dimension_numbers<[1], [0], [0], [1], [0, 0, 1, 1], [], []>} : vector<8x9xf32>, vector<9x768xf32>, vector<8x768xf32> -> vector<8x768xf32>
    %cst_6 = arith.constant dense<0.000000e+00> : vector<8xf32>
    %26 = vector.multi_reduction <add>, %23, %cst_6 [1] : vector<8x768xf32> to vector<8xf32>
    %27 = vector.shape_cast %26 : vector<8xf32> to vector<8x1xf32>
    %cst_7 = arith.constant 0.00148809527 : f32
    %28 = vector.broadcast %cst_7 : f32 to vector<8x1xf32>
    %29 = arith.mulf %27, %28 : vector<8x1xf32>
    %30 = arith.mulf %23, %23 : vector<8x768xf32>
    %cst_8 = arith.constant dense<0.000000e+00> : vector<8xf32>
    %31 = vector.multi_reduction <add>, %30, %cst_8 [1] : vector<8x768xf32> to vector<8xf32>
    %32 = vector.shape_cast %31 : vector<8xf32> to vector<8x1xf32>
    %cst_9 = arith.constant 0.00148809527 : f32
    %33 = vector.broadcast %cst_9 : f32 to vector<8x1xf32>
    %34 = arith.mulf %32, %33 : vector<8x1xf32>
    %35 = arith.mulf %29, %29 : vector<8x1xf32>
    %36 = arith.subf %34, %35 : vector<8x1xf32>
    %cst_10 = arith.constant 9.99999974E-6 : f32
    %37 = vector.broadcast %cst_10 : f32 to vector<8x1xf32>
    %38 = arith.addf %36, %37 : vector<8x1xf32>
    %39 = math.rsqrt %38 : vector<8x1xf32>
    %40 = arith.mulf %39, %6 : vector<8x1xf32>
    %41 = arith.mulf %29, %40 : vector<8x1xf32>
    %42 = arith.subf %7, %41 : vector<8x1xf32>
    %43 = vector.broadcast %40 : vector<8x1xf32> to vector<8x768xf32>
    %44 = arith.mulf %23, %43 : vector<8x768xf32>
    %45 = vector.broadcast %42 : vector<8x1xf32> to vector<8x768xf32>
    %46 = arith.addf %44, %45 : vector<8x768xf32>
    %cst_11 = arith.constant 0.000000e+00 : f32
    %47 = vector.broadcast %cst_11 : f32 to vector<8x768xf32>
    %48 = arith.maximumf %46, %47 : vector<8x768xf32>
    %cst_12 = arith.constant 0.000000e+00 : f32
    %49 = vector.broadcast %cst_12 : f32 to vector<8x768xf32>
    %50 = arith.select %21, %48, %49 : vector<8x768xi1>, vector<8x768xf32>
    %cst_13 = arith.constant 0.000000e+00 : f32
    %51 = vector.broadcast %cst_13 : f32 to vector<8x21xf32>
    %52 = vector.extract_strided_slice %50 {offsets = [0, 0], sizes = [8, 747], strides = [1, 1]} : vector<8x768xf32> to vector<8x747xf32>
    %53 = tpu.concatenate %51, %52 in 1 : vector<8x21xf32>, vector<8x747xf32> -> vector<8x768xf32>
    %54 = vector.extract_strided_slice %50 {offsets = [0, 21], sizes = [8, 747], strides = [1, 1]} : vector<8x768xf32> to vector<8x747xf32>
    %cst_14 = arith.constant 0.000000e+00 : f32
    %55 = vector.broadcast %cst_14 : f32 to vector<8x21xf32>
    %56 = tpu.concatenate %54, %55 in 1 : vector<8x747xf32>, vector<8x21xf32> -> vector<8x768xf32>
    %57 = tpu.concatenate %53, %50, %56 in 0 : vector<8x768xf32>, vector<8x768xf32>, vector<8x768xf32> -> vector<24x768xf32>
    %cst_15 = arith.constant dense<0.000000e+00> : vector<8x768xf32>
    %58 = tpu.matmul %3, %57, %cst_15 {dimension_numbers = #tpu.dot_dimension_numbers<[1], [0], [0], [1], [0, 0, 1, 1], [], []>} : vector<8x24xf32>, vector<24x768xf32>, vector<8x768xf32> -> vector<8x768xf32>
    %59 = vector.broadcast %5 : vector<8x1xf32> to vector<8x768xf32>
    %60 = arith.addf %58, %59 : vector<8x768xf32>
    %cst_16 = arith.constant 0.000000e+00 : f32
    %61 = vector.broadcast %cst_16 : f32 to vector<8x768xf32>
    %62 = arith.select %21, %60, %61 : vector<8x768xi1>, vector<8x768xf32>
    %cst_17 = arith.constant dense<0.000000e+00> : vector<8xf32>
    %63 = vector.multi_reduction <add>, %62, %cst_17 [1] : vector<8x768xf32> to vector<8xf32>
    %64 = vector.shape_cast %63 : vector<8xf32> to vector<8x1xf32>
    %cst_18 = arith.constant 0.00148809527 : f32
    %65 = vector.broadcast %cst_18 : f32 to vector<8x1xf32>
    %66 = arith.mulf %64, %65 : vector<8x1xf32>
    %67 = arith.mulf %62, %62 : vector<8x768xf32>
    %cst_19 = arith.constant dense<0.000000e+00> : vector<8xf32>
    %68 = vector.multi_reduction <add>, %67, %cst_19 [1] : vector<8x768xf32> to vector<8xf32>
    %69 = vector.shape_cast %68 : vector<8xf32> to vector<8x1xf32>
    %cst_20 = arith.constant 0.00148809527 : f32
    %70 = vector.broadcast %cst_20 : f32 to vector<8x1xf32>
    %71 = arith.mulf %69, %70 : vector<8x1xf32>
    %72 = arith.mulf %66, %66 : vector<8x1xf32>
    %73 = arith.subf %71, %72 : vector<8x1xf32>
    %cst_21 = arith.constant 9.99999974E-6 : f32
    %74 = vector.broadcast %cst_21 : f32 to vector<8x1xf32>
    %75 = arith.addf %73, %74 : vector<8x1xf32>
    %76 = math.rsqrt %75 : vector<8x1xf32>
    %77 = arith.mulf %76, %8 : vector<8x1xf32>
    %78 = arith.mulf %66, %77 : vector<8x1xf32>
    %79 = arith.subf %9, %78 : vector<8x1xf32>
    %80 = vector.broadcast %77 : vector<8x1xf32> to vector<8x768xf32>
    %81 = arith.mulf %60, %80 : vector<8x768xf32>
    %82 = vector.broadcast %79 : vector<8x1xf32> to vector<8x768xf32>
    %83 = arith.addf %81, %82 : vector<8x768xf32>
    %84 = arith.addf %83, %25 : vector<8x768xf32>
    %cst_22 = arith.constant 0.000000e+00 : f32
    %85 = vector.broadcast %cst_22 : f32 to vector<8x768xf32>
    %86 = arith.maximumf %84, %85 : vector<8x768xf32>
    %cst_23 = arith.constant 0.000000e+00 : f32
    %87 = vector.broadcast %cst_23 : f32 to vector<8x768xf32>
    %88 = arith.select %21, %86, %87 : vector<8x768xi1>, vector<8x768xf32>
    %c0_24 = arith.constant 0 : index
    %c0_25 = arith.constant 0 : index
    %89 = vector.load %arg3[%c0_24, %c0_25] : memref<8x768xf32, #tpu.memory_space<vmem>>, vector<8x768xf32>
    tpu.vector_store %arg3[%c0_24, %c0_25], %88 {strides = array<i32>} : memref<8x768xf32, #tpu.memory_space<vmem>>, vector<8x768xf32>,
    return
  }
}

</mosaic_0001>

<bundles_post_ra>
// kernel: squeeze.4
= control target key start
LH: loop header
LB: loop body
LE: loop exit
PB: predicated region body
PF: predicated region fallthrough
CT: control target
= control target key end

     0   :  { %vm7_vm0 = vcmask 64512   ;;  %s69_s0 = inlined_call_operand.vmem [shape: f32[16,4], index: 0, kind: input, shape index: {}]   ;;  %s70_s1 = inlined_call_operand.vmem [shape: f32[2,8,4], index: 1, kind: output, shape index: {}]  }
   0x1   :  { %v4_v0 = vld [vmem:[%s69_s0] sm:$0xf]  ;;  %s43_s0 = smov 120  }
   0x2   :  { %5 = vst [vmem:[#allocation1] sm:$0xf] %v4_v0 }
   0x9   :  { %v9_v1 = vld [vmem:[#allocation1] sm:$0xf]  }
   0xa   :  { %v6_v2 = vld [vmem:[#allocation1] sm:$0xf]   ;;  %10 = vrot.lane.b32.xlu0 %v9_v1, %s43_s0 }
   0xb   :  { %8 = vst.msk [vmem:[#allocation0] ss:$8 sm:$0xf] %vm7_vm0, %v6_v2  }
  0x7c   :  { %v11_v3 = vpop.permute.xlu0 %10  }
  0x7d   :  { %14 = vst.msk [vmem:[#allocation0 + $0x1] ss:$8 sm:$0xf] %vm7_vm0, %v11_v3  }
  0x84   :  { %v17_v4 = vld [vmem:[#allocation0] sm:$0x3]  ;;  %v22_v5 = vld [vmem:[#allocation0 + $0x8] sm:$0x3]  ;;  %v28_v6 = vld [vmem:[#allocation0 + $0x10] sm:$0x3] }
  0x85   :  { %20 = vst [vmem:[%s70_s1] sm:$0x3] %v17_v4  ;;  %v34_v7 = vld [vmem:[#allocation0 + $0x18] sm:$0x3] }
  0x86   :  { %39 = vst [vmem:[%s70_s1 + $0x2] sm:$0x3] %v22_v5 }
  0x87   :  { %40 = vst [vmem:[%s70_s1 + $0x4] sm:$0x3] %v28_v6 }
  0x88   :  { %41 = vst [vmem:[%s70_s1 + $0x6] sm:$0x3] %v34_v7 }

// kernel: st_gcn_forward.1
= control target key start
LH: loop header
LB: loop body
LE: loop exit
PB: predicated region body
PF: predicated region fallthrough
CT: control target
= control target key end

     0   :  { %vm83_vm0 = vcmask 1041408   ;;  %vm79_vm1 = vcmask 80896   ;;  %v810_v37 = vmov 1   ;;  %s811_s12 = smov 1   ;;  %v812_v53 = vmov 2   ;;  %s813_s17 = smov 107   ;;  %s1112_s0 = inlined_call_operand.vmem [shape: f32[10,768], index: 0, kind: input, shape index: {}]   ;;  %s1113_s2 = inlined_call_operand.vmem [shape: f32[32,128], index: 2, kind: input, shape index: {}]   ;;  %s1114_s1 = inlined_call_operand.vmem [shape: f32[9,768], index: 1, kind: input, shape index: {}]   ;;  %s1115_s3 = inlined_call_operand.vmem [shape: f32[8,768], index: 3, kind: output, shape index: {}]  }
   0x1   :  { %v75_v0 = vld [vmem:[%s1112_s0 + $0x40] sm:$0x3]  ;;  %v73_v1 = vld [vmem:[%s1112_s0 + $0x30] sm:$0x3]  ;;  %v74_v2 = vld [vmem:[%s1112_s0 + $0x38] sm:$0x3]  ;;  %781 = vset.pattern.permute.xlu1 %v810_v37  ;;  %782 = vset.pattern.permute.xlu2 %v812_v53  ;;  %v18_v56 = vlaneseq }
   0x2   :  { %740 = vmatpush.msk.msra.mxu2 %vm83_vm0, %v75_v0  ;;  %736 = vmatpush.msk.msra.mxu0 %vm83_vm0, %v73_v1  ;;  %v69_v3 = vld [vmem:[%s1112_s0 + $0x10] sm:$0xff]  ;;  %v76_v4 = vld [vmem:[%s1112_s0 + $0x48] sm:$0x3]  ;;  %v14_v5 = vld [vmem:[%s1113_s2] sm:$0xff]  ;;  %vm238_vm5 = vcmask 1040384   ;;  %s814_s18 = smov 21  }
   0x3   :  { %738 = vmatpush.msk.msra.mxu1 %vm83_vm0, %v74_v2  ;;  %742 = vmatpush.msk.msra.mxu3 %vm83_vm0, %v76_v4  ;;  %v67_v6 = vld [vmem:[%s1112_s0] sm:$0xff]  ;;  %v68_v7 = vld [vmem:[%s1112_s0 + $0x8] sm:$0xff]  ;;  %v70_v8 = vld [vmem:[%s1112_s0 + $0x18] sm:$0xff]  ;;  %v907_v57 = vand.u32 127, %v18_v56  ;;  %vm234_vm10 = vcmask 72704   ;;  %vm496_vm11 = vcmask 875520  }
   0x4   :  { %157 = vmatpush.msra.mxu2 %v69_v3  ;;  %117 = vmatpush.msra.mxu0 %v67_v6  ;;  %v77_v9 = vld [vmem:[%s1112_s0 + $0x50] sm:$0x3]  ;;  %v78_v10 = vld [vmem:[%s1112_s0 + $0x58] sm:$0x3]  ;;  %v71_v11 = vld [vmem:[%s1112_s0 + $0x20] sm:$0xff]  ;;  %vm471_vm12 = vcmask 171008  }
   0x5   :  { %741 = vmatmul.msk.f32.vlgmr.msra.gmra.mxu2 %vm79_vm1, %v14_v5  ;;  %137 = vmatpush.msra.mxu1 %v68_v7  ;;  %v72_v12 = vld [vmem:[%s1112_s0 + $0x28] sm:$0xff]  ;;  %v902_v48 = vld [vmem:[%s1113_s2 + $0x18] sm:$0xff]  ;;  %v910_v59 = vadd.s32 256, %v907_v57  ;;  %v913_v60 = vadd.s32 384, %v907_v57  ;;  %v228_v3 = vld [vmem:[%s1114_s1 + $0x30] sm:$0x1] }
   0x6   :  { %177 = vmatpush.msra.mxu3 %v70_v8  ;;  %737 = vmatmul.msk.f32.vlgmr.msra.gmra.mxu0 %vm79_vm1, %v14_v5  ;;  %v222_v4 = vld [vmem:[%s1114_s1] sm:$0xff]  ;;  %vm25_vm8 = vcmp.ge.s32.totalorder %v907_v57, 21  ;;  %v224_v37 = vld [vmem:[%s1114_s1 + $0x10] sm:$0xff]  ;;  %vm514_vm13 = vcmask 195584   ;;  %vm761_vm14 = vmneg %vm471_vm12 }
   0x7   :  { %739 = vmatmul.msk.f32.vlgmr.msra.gmra.mxu1 %vm79_vm1, %v14_v5  ;;  %743 = vmatmul.msk.f32.vlgmr.msra.gmra.mxu3 %vm79_vm1, %v14_v5  ;;  %vm33_vm6 = vcmp.lt.s32.totalorder %v910_v59, 357  ;;  %vm46_vm7 = vcmp.ge.s32.totalorder %v913_v60, 399 }
   0x8   :  { %744 = vmatpush.msk.msrb.mxu0 %vm83_vm0, %v77_v9  ;;  %746 = vmatpush.msk.msrb.mxu1 %vm83_vm0, %v78_v10 }
   0x9   :  { %748 = vmatpush.msk.msrb.mxu2 %vm238_vm5, %v228_v3 }
   0xa   :  { %197 = vmatpush.msrb.mxu0 %v71_v11  ;;  %217 = vmatpush.msrb.mxu1 %v72_v12 }
   0xb   :  { %272 = vmatpush.msrb.mxu2 %v222_v4 }
   0xe   :  { %745 = vmatmul.msk.f32.vlgmr.msrb.gmra.mxu0 %vm79_vm1, %v14_v5 }
   0xf   :  { %747 = vmatmul.msk.f32.vlgmr.msrb.gmra.mxu1 %vm79_vm1, %v14_v5 }
  0x83   :  { %v889_v13 = vpop.f32.mrf.mxu0 }
  0x84   :  { %v139_v14 = vpop.f32.mrf.mxu1  ;;  %v385_v15 = vmul.f32 %v889_v13, %v889_v13 }
  0x85   :  { %v386_v16 = vmul.f32 %v139_v14, %v139_v14  ;;  %v377_v17 = vadd.f32 %v139_v14, %v889_v13 }
  0x87   :  { %v391_v19 = vadd.f32 %v386_v16, %v385_v15 }
  0x88   :  { %v159_v18 = vpop.f32.mrf.mxu2 }
  0x89   :  { %v378_v20 = vadd.f32 %v377_v17, %v159_v18  ;;  %v387_v21 = vmul.f32 %v159_v18, %v159_v18 }
  0x8a   :  { %v179_v22 = vpop.f32.mrf.mxu3 }
  0x8b   :  { %v392_v23 = vadd.f32 %v391_v19, %v387_v21  ;;  %v379_v24 = vadd.f32 %v378_v20, %v179_v22  ;;  %v388_v25 = vmul.f32 %v179_v22, %v179_v22  ;;  %v199_v26 = vpop.f32.mrf.mxu0 }
  0x8c   :  { %v894_v27 = vpop.f32.mrf.mxu1  ;;  %v389_v29 = vmul.f32 %v199_v26, %v199_v26 }
  0x8d   :  { %v380_v28 = vadd.f32 %v379_v24, %v199_v26  ;;  %v393_v31 = vadd.f32 %v392_v23, %v388_v25  ;;  %v390_v32 = vmul.f32 %v894_v27, %v894_v27 }
  0x8f   :  { %v381_v30 = vadd.f32 %v380_v28, %v894_v27  ;;  %v394_v33 = vadd.f32 %v393_v31, %v389_v29  ;;  %v226_v28 = vld [vmem:[%s1114_s1 + $0x20] sm:$0xff]  ;;  %v15_v29 = vld [vmem:[%s1113_s2 + $0x8] sm:$0xff] }
  0x90   :  { %749 = vmatmul.msk.f32.vlgmr.msrb.gmra.mxu2 %vm234_vm10, %v15_v29  ;;  %v223_v31 = vld [vmem:[%s1114_s1 + $0x8] sm:$0xff] }
  0x91   :  { %382 = vadd.xlane.f32.xlu0 %v381_v30  ;;  %v395_v34 = vadd.f32 %v394_v33, %v390_v32  ;;  %v229_v30 = vld [vmem:[%s1114_s1 + $0x38] sm:$0x1]  ;;  %v231_v32 = vld [vmem:[%s1114_s1 + $0x48] sm:$0x1] }
  0x92   :  { %750 = vmatpush.msk.msrb.mxu3 %vm238_vm5, %v229_v30  ;;  %754 = vmatpush.msk.msra.mxu1 %vm238_vm5, %v231_v32  ;;  %v225_v33 = vld [vmem:[%s1114_s1 + $0x18] sm:$0xff] }
  0x94   :  { %292 = vmatpush.msrb.mxu3 %v223_v31  ;;  %332 = vmatpush.msra.mxu1 %v225_v33 }
  0x95   :  { %751 = vmatmul.msk.f32.vlgmr.msrb.gmra.mxu3 %vm234_vm10, %v15_v29  ;;  %755 = vmatmul.msk.f32.vlgmr.msra.gmra.mxu1 %vm234_vm10, %v15_v29 }
  0x99   :  { %396 = vadd.xlane.f32.xlu0 %v395_v34  ;;  %v233_v34 = vld [vmem:[%s1114_s1 + $0x58] sm:$0x1] }
  0x9a   :  { %758 = vmatpush.msk.msra.mxu3 %vm238_vm5, %v233_v34 }
 0x104   :  { %v383_v35 = vpop.xlane.xlu0 %382 }
 0x105   :  { %v384_v36 = vmul.f32 0.0014880953, %v383_v35  ;;  %v230_v35 = vld [vmem:[%s1114_s1 + $0x40] sm:$0x1] }
 0x106   :  { %752 = vmatpush.msk.msra.mxu0 %vm238_vm5, %v230_v35 }
 0x107   :  { %v399_v39 = vmul.f32 %v384_v36, %v384_v36 }
 0x108   :  { %312 = vmatpush.msra.mxu0 %v224_v37 }
 0x109   :  { %753 = vmatmul.msk.f32.vlgmr.msra.gmra.mxu0 %vm234_vm10, %v15_v29 }
 0x10c   :  { %v397_v38 = vpop.xlane.xlu0 %396 }
 0x10d   :  { %v398_v40 = vmul.f32 0.0014880953, %v397_v38 }
 0x10f   :  { %v400_v41 = vsub.f32 %v398_v40, %v399_v39 }
 0x111   :  { %v401_v42 = vadd.f32 1e-05, %v400_v41 }
 0x113   :  { %806 = vrsqrt.f32 %v401_v42  ;;  %vm408_vm3 = vweird.f32 %v401_v42 }
 0x119   :  { %v807_v43 = vpop.eup %806 }
 0x11a   :  { %v403_v44 = vmul.f32 %v807_v43, %v401_v42  ;;  %vm409_vm2 = vweird.f32 %v807_v43 }
 0x11b   :  { %vm410_vm4 = vmor %vm408_vm3, %vm409_vm2 }
 0x11c   :  { %v404_v45 = vmul.f32 %v807_v43, %v403_v44 }
 0x11e   :  { %v405_v46 = vmul.f32 0.5, %v404_v45  ;;  %v16_v45 = vld [vmem:[%s1113_s2 + $0x10] sm:$0xff] }
 0x120   :  { %v406_v47 = vsub.f32 1.5, %v405_v46 }
 0x122   :  { %v407_v49 = vmul.f32 %v807_v43, %v406_v47  ;;  %v815_v47 = vmov 0  }
 0x123   :  { %803 = vset.pattern.permute.xlu0 %v815_v47  ;;  %v816_v47 = vmov 3  }
 0x124   :  { %v411_v50 = vsel %vm410_vm4, %v807_v43, %v407_v49 }
 0x125   :  { %v412_v51 = vmul.f32 %v411_v50, %v902_v48 }
 0x127   :  { %v413_v52 = vmul.f32 %v412_v51, %v384_v36  ;;  %v227_v36 = vld [vmem:[%s1114_s1 + $0x28] sm:$0xff] }
 0x128   :  { %372 = vmatpush.msra.mxu3 %v227_v36 }
 0x129   :  { %415 = vrot.lane.b32.xlu1 %v413_v52, %s811_s12  ;;  %759 = vmatmul.msk.f32.vlgmr.msra.gmra.mxu3 %vm234_vm10, %v15_v29 }
 0x131   :  { %421 = vperm.xlu1 %781, %v412_v51  }
 0x19b   :  { %v416_v54 = vpop.permute.xlu1 %415 }
 0x19c   :  { %v418_v55 = vsub.f32 %v902_v48, %v416_v54 }
 0x19e   :  { %432 = vperm.xlu2 %782, %v418_v55  }
 0x1a3   :  { %v422_v58 = vpop.permute.xlu1 %421 }
 0x1a4   :  { %v425_v61 = vmul.f32 %v422_v58, %v139_v14  ;;  %v426_v62 = vmul.f32 %v422_v58, %v159_v18  ;;  %v427_v63 = vmul.f32 %v422_v58, %v179_v22  ;;  %v424_v0 = vmul.f32 %v422_v58, %v889_v13 }
 0x1a5   :  { %v428_v2 = vmul.f32 %v422_v58, %v199_v26  ;;  %v429_v20 = vmul.f32 %v422_v58, %v894_v27  ;;  %v955_v22 = vadd.s32 640, %v907_v57  ;;  %v232_v27 = vld [vmem:[%s1114_s1 + $0x50] sm:$0x1] }
 0x1a6   :  { %756 = vmatpush.msk.msra.mxu2 %vm238_vm5, %v232_v27 }
 0x1a7   :  { %vm54_vm9 = vcmp.lt.s32.totalorder %v955_v22, 735 }
 0x1a8   :  { %352 = vmatpush.msra.mxu2 %v226_v28 }
 0x1a9   :  { %757 = vmatmul.msk.f32.vlgmr.msra.gmra.mxu2 %vm234_vm10, %v15_v29 }
 0x1f8   :  { %v433_v1 = vpop.permute.xlu2 %432 }
 0x1f9   :  { %v436_v5 = vadd.f32 %v433_v1, %v425_v61  ;;  %v922_v6 = vadd.f32 %v433_v1, %v426_v62  ;;  %v924_v7 = vadd.f32 %v433_v1, %v427_v63  ;;  %v926_v8 = vadd.f32 %v433_v1, %v424_v0 }
 0x1fa   :  { %v439_v9 = vadd.f32 %v433_v1, %v428_v2  ;;  %v952_v21 = vadd.f32 %v433_v1, %v429_v20 }
 0x1fb   :  { %v932_v10 = vmax.f32 %v436_v5, 0.0  ;;  %v443_v11 = vmax.f32 %v922_v6, 0.0  ;;  %v444_v12 = vmax.f32 %v924_v7, 0.0  ;;  %v441_v13 = vmax.f32 %v926_v8, 0.0  ;;  %v1047_v6 = vpop.f32.mrf.mxu2  ;;  %v1049_v7 = vpop.f32.mrf.mxu3 }
 0x1fc   :  { %v937_v14 = vmax.f32 %v439_v9, 0.0  ;;  %v446_v24 = vmax.f32 %v952_v21, 0.0  ;;  %v1051_v8 = vpop.f32.mrf.mxu1 }
 0x1fd   :  { %486 = vrot.lane.b32.xlu1 %v932_v10, %s813_s17  ;;  %v449_v15 = vsel %vm33_vm6, %v443_v11, 0.0  ;;  %v450_v16 = vsel %vm46_vm7, %v444_v12, 0.0  ;;  %v447_v17 = vsel %vm25_vm8, %v441_v13, 0.0 }
 0x1fe   :  { %v783_v18 = vpack.i.bf16 %v450_v16, %v449_v15  ;;  %v788_v19 = vpack.i.bf16 %v447_v17, %v937_v14  ;;  %v793_v23 = vpack.i.bf16 %v449_v15, %v932_v10  ;;  %v452_v25 = vsel %vm54_vm9, %v446_v24, 0.0 }
 0x1ff   :  { %v798_v26 = vpack.i.bf16 %v452_v25, %v937_v14 }
 0x200   :  { %784 = vrot.lane.b32.xlu2 %v783_v18, %s813_s17  ;;  %789 = vrot.lane.b32.xlu0 %v788_v19, %s813_s17 }
 0x205   :  { %465 = vrot.lane.b32.xlu1 %v450_v16, %s814_s18 }
 0x208   :  { %794 = vrot.lane.b32.xlu2 %v793_v23, %s814_s18  ;;  %511 = vperm.xlu0 %803, %v902_v48  }
 0x20d   :  { %494 = vrot.lane.b32.xlu1 %v452_v25, %s813_s17 }
 0x210   :  { %459 = vrot.lane.b32.xlu2 %v447_v17, %s814_s18  ;;  %804 = vset.pattern.permute.xlu0 %v816_v47 }
 0x218   :  { %799 = vrot.lane.b32.xlu2 %v798_v26, %s814_s18 }
 0x22c   :  { %v1053_v9 = vpop.f32.mrf.mxu2 }
 0x25a   :  { %v785_v38 = vpop.permute.xlu2 %784 }
 0x25b   :  { %v787_v39 = vunpack.i.h.bf16 %v785_v38  ;;  %v786_v40 = vunpack.i.l.bf16 %v785_v38 }
 0x25d   :  { %v499_v41 = vsel %vm496_vm11, %v786_v40, %v787_v39 }
 0x25e   :  { %571 = vmatpush.msrb.mxu2 %v499_v41 }
 0x260   :  { %765 = vmatpush.msk.msrb.mxu2 %vm33_vm6, %v443_v11  ;;  %v1057_v11 = vpop.f32.mrf.mxu3 }
 0x262   :  { %v795_v42 = vpop.permute.xlu2 %794 }
 0x263   :  { %v797_v43 = vunpack.i.h.bf16 %v795_v42  ;;  %v796_v44 = vunpack.i.l.bf16 %v795_v42 }
 0x265   :  { %v473_v46 = vsel %vm471_vm12, %v796_v44, %v797_v43 }
 0x266   :  { %573 = vmatpush.msrb.mxu2 %v473_v46 }
 0x267   :  { %766 = vmatmul.msk.f32.vlgmr.msrb.gmra.mxu2 %vm514_vm13, %v16_v45 }
 0x26a   :  { %v460_v51 = vpop.permute.xlu2 %459 }
 0x26b   :  { %v472_v55 = vsel %vm471_vm12, %v460_v51, %v796_v44 }
 0x26f   :  { %v487_v49 = vpop.permute.xlu1 %486 }
 0x270   :  { %v498_v50 = vsel %vm496_vm11, %v487_v49, %v786_v40 }
 0x271   :  { %551 = vmatpush.msrb.mxu1 %v498_v50 }
 0x272   :  { %v790_v52 = vpop.permute.xlu0 %789  ;;  %v800_v63 = vpop.permute.xlu2 %799 }
 0x273   :  { %v792_v53 = vunpack.i.h.bf16 %v790_v52  ;;  %v791_v54 = vunpack.i.l.bf16 %v790_v52  ;;  %552 = vmatpush.msrb.mxu1 %v932_v10  ;;  %v802_v0 = vunpack.i.h.bf16 %v800_v63  ;;  %v801_v1 = vunpack.i.l.bf16 %v800_v63  ;;  %v1055_v10 = vpop.f32.mrf.mxu0 }
 0x275   :  { %553 = vmatpush.msrb.mxu1 %v472_v55  ;;  %v497_v56 = vsel %vm496_vm11, %v792_v53, %v487_v49  ;;  %v500_v58 = vsel %vm496_vm11, %v787_v39, %v791_v54  ;;  %v476_v4 = vsel %vm471_vm12, %v801_v1, %v802_v0 }
 0x276   :  { %531 = vmatpush.msrb.mxu0 %v497_v56  ;;  %591 = vmatpush.msrb.mxu3 %v500_v58 }
 0x277   :  { %v466_v61 = vpop.permute.xlu1 %465  ;;  %764 = vmatmul.msk.f32.vlgmr.msrb.gmra.mxu1 %vm514_vm13, %v16_v45 }
 0x278   :  { %760 = vmatpush.msk.msrb.mxu0 %vm25_vm8, %v441_v13  ;;  %767 = vmatpush.msk.msrb.mxu3 %vm46_vm7, %v444_v12  ;;  %v474_v62 = vsel %vm471_vm12, %v797_v43, %v466_v61  ;;  %v475_v5 = vsel %vm471_vm12, %v466_v61, %v801_v1 }
 0x27a   :  { %762 = vmatpush.msk.msrb.mxu0 %vm761_vm14, %v460_v51  ;;  %593 = vmatpush.msrb.mxu3 %v474_v62  ;;  %v512_v12 = vpop.permute.xlu0 %511 }
 0x27b   :  { %768 = vmatmul.msk.f32.vlgmr.msrb.gmra.mxu3 %vm514_vm13, %v16_v45  ;;  %763 = vmatmul.msk.f32.vlgmr.msrb.gmra.mxu0 %vm514_vm13, %v16_v45 }
 0x27f   :  { %v495_v2 = vpop.permute.xlu1 %494 }
 0x280   :  { %v501_v3 = vsel %vm496_vm11, %v791_v54, %v495_v2  ;;  %770 = vmatpush.msk.msra.mxu1 %vm496_vm11, %v495_v2 }
 0x281   :  { %611 = vmatpush.msra.mxu0 %v501_v3  ;;  %v817_v3 = vmov 4  }
 0x282   :  { %771 = vmatpush.msk.msra.mxu1 %vm54_vm9, %v446_v24 }
 0x283   :  { %612 = vmatpush.msra.mxu0 %v937_v14 }
 0x284   :  { %633 = vmatpush.msra.mxu1 %v476_v4 }
 0x285   :  { %613 = vmatpush.msra.mxu0 %v475_v5  ;;  %772 = vmatmul.msk.f32.vlgmr.msra.gmra.mxu1 %vm514_vm13, %v16_v45 }
 0x286   :  { %769 = vmatmul.msk.f32.vlgmr.msra.gmra.mxu0 %vm514_vm13, %v16_v45 }
 0x2ea   :  { %v575_v14 = vpop.f32.mrf.mxu2 }
 0x2eb   :  { %v1061_v16 = vadd.f32 %v575_v14, %v512_v12 }
 0x2ed   :  { %v640_v21 = vsel %vm33_vm6, %v1061_v16, 0.0 }
 0x2ee   :  { %v654_v26 = vmul.f32 %v640_v21, %v640_v21 }
 0x2f4   :  { %v555_v13 = vpop.f32.mrf.mxu1 }
 0x2f5   :  { %v1059_v15 = vadd.f32 %v555_v13, %v512_v12 }
 0x2f7   :  { %v653_v19 = vmul.f32 %v1059_v15, %v1059_v15 }
 0x2f8   :  { %v535_v17 = vpop.f32.mrf.mxu0 }
 0x2f9   :  { %v536_v18 = vadd.f32 %v535_v17, %v512_v12 }
 0x2fb   :  { %v638_v20 = vsel %vm25_vm8, %v536_v18, 0.0 }
 0x2fc   :  { %v644_v23 = vadd.f32 %v638_v20, %v1059_v15  ;;  %v652_v24 = vmul.f32 %v638_v20, %v638_v20 }
 0x2fe   :  { %v658_v25 = vadd.f32 %v653_v19, %v652_v24  ;;  %v595_v27 = vpop.f32.mrf.mxu3  ;;  %v645_v29 = vadd.f32 %v644_v23, %v640_v21 }
 0x2ff   :  { %v596_v28 = vadd.f32 %v595_v27, %v512_v12 }
 0x300   :  { %v659_v31 = vadd.f32 %v658_v25, %v654_v26 }
 0x301   :  { %v641_v30 = vsel %vm46_vm7, %v596_v28, 0.0 }
 0x302   :  { %v655_v32 = vmul.f32 %v641_v30, %v641_v30  ;;  %v635_v33 = vpop.f32.mrf.mxu1  ;;  %v646_v36 = vadd.f32 %v645_v29, %v641_v30 }
 0x303   :  { %v636_v34 = vadd.f32 %v635_v33, %v512_v12  ;;  %v615_v35 = vpop.f32.mrf.mxu0 }
 0x304   :  { %v616_v37 = vadd.f32 %v615_v35, %v512_v12  ;;  %v660_v41 = vadd.f32 %v659_v31, %v655_v32 }
 0x305   :  { %v643_v38 = vsel %vm54_vm9, %v636_v34, 0.0 }
 0x306   :  { %v656_v39 = vmul.f32 %v616_v37, %v616_v37  ;;  %v647_v40 = vadd.f32 %v646_v36, %v616_v37  ;;  %v657_v43 = vmul.f32 %v643_v38, %v643_v38 }
 0x308   :  { %v648_v42 = vadd.f32 %v647_v40, %v643_v38  ;;  %v661_v44 = vadd.f32 %v660_v41, %v656_v39 }
 0x30a   :  { %649 = vadd.xlane.f32.xlu1 %v648_v42  ;;  %v662_v45 = vadd.f32 %v661_v44, %v657_v43 }
 0x30c   :  { %663 = vadd.xlane.f32.xlu2 %v662_v45 }
 0x37d   :  { %v650_v46 = vpop.xlane.xlu1 %649 }
 0x37e   :  { %v651_v49 = vmul.f32 0.0014880953, %v650_v46 }
 0x37f   :  { %v664_v50 = vpop.xlane.xlu2 %663 }
 0x380   :  { %v666_v51 = vmul.f32 %v651_v49, %v651_v49  ;;  %v665_v52 = vmul.f32 0.0014880953, %v664_v50 }
 0x382   :  { %v667_v53 = vsub.f32 %v665_v52, %v666_v51 }
 0x384   :  { %v668_v54 = vadd.f32 1e-05, %v667_v53 }
 0x386   :  { %808 = vrsqrt.f32 %v668_v54  ;;  %vm675_vm0 = vweird.f32 %v668_v54 }
 0x38c   :  { %v809_v55 = vpop.eup %808 }
 0x38d   :  { %v670_v56 = vmul.f32 %v809_v55, %v668_v54  ;;  %vm676_vm15 = vweird.f32 %v809_v55 }
 0x38e   :  { %vm677_vm1 = vmor %vm675_vm0, %vm676_vm15 }
 0x38f   :  { %v671_v58 = vmul.f32 %v809_v55, %v670_v56 }
 0x391   :  { %v672_v61 = vmul.f32 0.5, %v671_v58 }
 0x393   :  { %v673_v62 = vsub.f32 1.5, %v672_v61 }
 0x395   :  { %v674_v63 = vmul.f32 %v809_v55, %v673_v62 }
 0x397   :  { %v678_v0 = vsel %vm677_vm1, %v809_v55, %v674_v63 }
 0x398   :  { %v679_v1 = vmul.f32 %v678_v0, %v902_v48 }
 0x39a   :  { %v680_v2 = vmul.f32 %v679_v1, %v651_v49 }
 0x39c   :  { %682 = vrot.lane.b32.xlu0 %v680_v2, %s811_s12 }
 0x3a4   :  { %688 = vperm.xlu0 %804, %v679_v1  }
 0x3ac   :  { %805 = vset.pattern.permute.xlu0 %v817_v3 }
 0x40e   :  { %v683_v4 = vpop.permute.xlu0 %682 }
 0x40f   :  { %v685_v5 = vsub.f32 %v902_v48, %v683_v4 }
 0x411   :  { %699 = vperm.xlu0 %805, %v685_v5  }
 0x416   :  { %v689_v12 = vpop.permute.xlu0 %688 }
 0x417   :  { %v691_v13 = vmul.f32 %v689_v12, %v536_v18  ;;  %v692_v14 = vmul.f32 %v689_v12, %v1059_v15  ;;  %v693_v17 = vmul.f32 %v689_v12, %v1061_v16  ;;  %v694_v19 = vmul.f32 %v689_v12, %v596_v28 }
 0x418   :  { %v695_v20 = vmul.f32 %v689_v12, %v616_v37  ;;  %v696_v21 = vmul.f32 %v689_v12, %v636_v34 }
 0x483   :  { %v700_v23 = vpop.permute.xlu0 %699 }
 0x484   :  { %v702_v24 = vadd.f32 %v700_v23, %v691_v13  ;;  %v703_v25 = vadd.f32 %v700_v23, %v692_v14  ;;  %v704_v26 = vadd.f32 %v700_v23, %v693_v17  ;;  %v705_v27 = vadd.f32 %v700_v23, %v694_v19 }
 0x485   :  { %v706_v29 = vadd.f32 %v700_v23, %v695_v20  ;;  %v707_v30 = vadd.f32 %v700_v23, %v696_v21 }
 0x486   :  { %v708_v31 = vadd.f32 %v702_v24, %v1047_v6  ;;  %v709_v48 = vadd.f32 %v703_v25, %v1049_v7  ;;  %v710_v18 = vadd.f32 %v704_v26, %v1055_v10  ;;  %v711_v15 = vadd.f32 %v705_v27, %v1051_v8 }
 0x487   :  { %v712_v16 = vadd.f32 %v706_v29, %v1053_v9  ;;  %v713_v28 = vadd.f32 %v707_v30, %v1057_v11 }
 0x488   :  { %v714_v32 = vmax.f32 %v708_v31, 0.0  ;;  %v715_v33 = vmax.f32 %v709_v48, 0.0  ;;  %v716_v34 = vmax.f32 %v710_v18, 0.0  ;;  %v717_v35 = vmax.f32 %v711_v15, 0.0 }
 0x489   :  { %v719_v36 = vmax.f32 %v713_v28, 0.0  ;;  %v718_v37 = vmax.f32 %v712_v16, 0.0 }
 0x48a   :  { %v720_v38 = vsel %vm25_vm8, %v714_v32, 0.0  ;;  %v722_v6 = vsel %vm33_vm6, %v716_v34, 0.0  ;;  %v723_v7 = vsel %vm46_vm7, %v717_v35, 0.0  ;;  %727 = vst [vmem:[%s1115_s3 + $0x8] sm:$0xff] %v715_v33 }
 0x48b   :  { %726 = vst [vmem:[%s1115_s3] sm:$0xff] %v720_v38  ;;  %v725_v8 = vsel %vm54_vm9, %v719_v36, 0.0 }
 0x48c   :  { %728 = vst [vmem:[%s1115_s3 + $0x10] sm:$0xff] %v722_v6 }
 0x48d   :  { %729 = vst [vmem:[%s1115_s3 + $0x18] sm:$0xff] %v723_v7 }
 0x48e   :  { %730 = vst [vmem:[%s1115_s3 + $0x20] sm:$0xff] %v718_v37 }
 0x48f   :  { %731 = vst [vmem:[%s1115_s3 + $0x28] sm:$0xff] %v725_v8 }

</bundles_post_ra>
